<compile_context>
chip_gen: v5e
topology: v5e:2x2
jax: 0.10.0
libtpu: 0.0.40
codegen_flags: <defaults>
</compile_context>

<pallas_src>
import math

import jax
import jax.numpy as jnp
from jax.experimental import pallas as pl
from jax.experimental.pallas import tpu as pltpu

HIDDEN_LOGICAL = 100   # hidden width in the PyTorch module
HIDDEN = 128           # zero-padded, lane-aligned hidden width used on-chip


# ----------------------------- Pallas kernel --------------------------------
def hyperprefix_mlp_kernel(h1b_ref, b1_ref, w2_ref, b2_ref, w3_ref, b3_ref,
                           o_ref):
    # grid = (output tile j,).  Per step:
    #   h1b_ref: (B, H)     block_emb @ w1_block, shared across tasks
    #   b1_ref : (T, H)     per-task effective layer-1 bias (task emb folded)
    #   w2_ref : (H, H),  b2_ref: (1, H)
    #   w3_ref : (H, TN), b3_ref: (1, TN)   current output tile of layer 3
    #   o_ref  : (T, B, TN)
    T, H = b1_ref.shape
    B = h1b_ref.shape[0]
    tn = w3_ref.shape[1]
    wdt = w2_ref.dtype                       # f32 or bf16 weights

    # Layer 1: broadcast-add the per-task bias, ReLU, flatten tasks into rows.
    h1 = jnp.maximum(h1b_ref[...][None, :, :] + b1_ref[...][:, None, :], 0.0)
    h1 = h1.reshape(T * B, H)                # (T*B, H): better MXU fill

    # Layer 2 (recomputed per output tile; negligible at T*B rows).
    h2 = jnp.dot(h1.astype(wdt), w2_ref[...],
                 preferred_element_type=jnp.float32) + b2_ref[...]
    h2 = jnp.maximum(h2, 0.0)

    # Layer 3: current output tile.
    out = jnp.dot(h2.astype(wdt), w3_ref[...],
                  preferred_element_type=jnp.float32) + b3_ref[...]
    o_ref[...] = out.reshape(T, B, tn).astype(o_ref.dtype)


def _pick_tn(out_dim, rows, w_itemsize, tn=None):
    """Choose the output tile width.

    Prefers the largest lane-aligned tile whose double-buffered streamed
    traffic (w3 tile + b3 tile + output tile) stays well under v7x's 32 MiB
    default scoped VMEM, while keeping >= 2 grid steps so both v7x
    TensorCores get work.
    """
    if tn is not None:
        assert out_dim % tn == 0, "tn must divide out_dim"
        return tn
    if out_dim % 128 != 0:
        return out_dim           # full-extent fallback (masked partial stores)
    cap = out_dim // 2 if out_dim >= 256 else out_dim
    budget = 20 * 1024 * 1024    # leave headroom under 32 MiB scoped VMEM
    for cand in (4096, 2048, 1024, 512, 256, 128):
        if cand > cap or out_dim % cand != 0:
            continue
        streamed = 2 * (HIDDEN * cand * w_itemsize   # w3 tile (double-buffered)
                        + cand * 4                   # b3 tile
                        + rows * cand * 4)           # output tile
        if streamed <= budget:
            return cand
    return 128


def hyperprefix_mlp(h1_base, b1_eff, w2, b2, w3, b3, *, tn=None):
    """Layers 2/3 of the hnet MLP for T tasks in one pallas_call.

    h1_base: (B, H)  block_emb @ w1_block (layer-1 matmul hoisted out)
    b1_eff : (T, H)  per-task effective layer-1 bias
    w2: (H, H)  b2: (1, H)    w3: (H, out_dim)   b3: (1, out_dim)
    returns (T, B, out_dim) float32.
    """
    B, H = h1_base.shape
    T = b1_eff.shape[0]
    out_dim = w3.shape[1]
    tn = _pick_tn(out_dim, T * B, w3.dtype.itemsize, tn)
    n_j = out_dim // tn

    b2 = b2.reshape(1, H)
    b3 = b3.reshape(1, out_dim)

    rows = T * B
    # Each operand is streamed exactly once; layer 2 is recomputed per tile.
    flops = 2 * rows * H * H * n_j + 2 * rows * H * out_dim
    operands = (h1_base, b1_eff, w2, b2, w3, b3)
    bytes_accessed = int(sum(a.size * a.dtype.itemsize for a in operands)
                         + rows * out_dim * 4)

    return pl.pallas_call(
        hyperprefix_mlp_kernel,
        out_shape=jax.ShapeDtypeStruct((T, B, out_dim), jnp.float32),
        grid_spec=pltpu.PrefetchScalarGridSpec(
            num_scalar_prefetch=0,
            grid=(n_j,),
            in_specs=[
                pl.BlockSpec((B, H), lambda j: (0, 0)),    # h1_base (resident)
                pl.BlockSpec((T, H), lambda j: (0, 0)),    # b1_eff  (resident)
                pl.BlockSpec((H, H), lambda j: (0, 0)),    # w2      (resident)
                pl.BlockSpec((1, H), lambda j: (0, 0)),    # b2      (resident)
                pl.BlockSpec((H, tn), lambda j: (0, j)),   # w3 tile (streamed)
                pl.BlockSpec((1, tn), lambda j: (0, j)),   # b3 tile (streamed)
            ],
            out_specs=pl.BlockSpec((T, B, tn), lambda j: (0, 0, j)),
        ),
        compiler_params=pltpu.CompilerParams(
            dimension_semantics=("parallel",)),
        cost_estimate=pl.CostEstimate(
            flops=int(flops), transcendentals=0,
            bytes_accessed=bytes_accessed),
    )(h1_base, b1_eff, w2, b2, w3, b3)


# --------------------------- Parameter container -----------------------------
class HyperPrefixParams:
    """Deterministic synthetic init mirroring HyperPrefix.__init__ shapes.

    Logical (PyTorch-shaped, hidden=100) weights are kept for the reference
    check; the kernel uses zero-padded, pre-transposed (in, out) copies with
    hidden=128 so padded columns stay exactly zero through the ReLUs.
    """

    def __init__(self, key, task_nums, block_nums, task_emb_dims,
                 block_emb_dims, in_dims, prefix_length,
                 weight_dtype=jnp.float32):
        self.task_nums = task_nums
        self.block_nums = block_nums
        self.task_emb_dims = task_emb_dims
        self.block_emb_dims = block_emb_dims
        self.in_dims = in_dims
        self.prefix_length = prefix_length
        self.input_dim = task_emb_dims + block_emb_dims   # use_block_emb=True
        self.out_dim = 2 * in_dims * prefix_length        # use_block_emb=True

        ks = jax.random.split(key, 8)

        def linear(kw, kb, fan_in, fan_out):
            bound = 1.0 / math.sqrt(float(fan_in))
            w = jax.random.uniform(kw, (fan_in, fan_out), jnp.float32,
                                   -bound, bound)
            b = jax.random.uniform(kb, (fan_out,), jnp.float32, -bound, bound)
            return w, b

        # Embeddings: normal(0, 0.1)
        self.task_embs = 0.1 * jax.random.normal(
            ks[0], (task_nums, task_emb_dims), jnp.float32)
        self.block_emb = 0.1 * jax.random.normal(
            ks[1], (block_nums, block_emb_dims), jnp.float32)

        # Logical weights (hidden = 100), pre-transposed to (in, out).
        self.w1, self.b1 = linear(ks[2], ks[3], self.input_dim, HIDDEN_LOGICAL)
        self.w2, self.b2 = linear(ks[4], ks[5], HIDDEN_LOGICAL, HIDDEN_LOGICAL)
        self.w3, self.b3 = linear(ks[6], ks[7], HIDDEN_LOGICAL, self.out_dim)

        # Zero-padded, lane-aligned kernel weights (hidden = 128).
        pad_h = HIDDEN - HIDDEN_LOGICAL
        w1_p = jnp.pad(self.w1, ((0, 0), (0, pad_h)))        # (input_dim, 128)
        self.b1_p = jnp.pad(self.b1, (0, pad_h))              # (128,)
        self.w2_p = jnp.pad(self.w2, ((0, pad_h), (0, pad_h))).astype(weight_dtype)
        self.b2_p = jnp.pad(self.b2, (0, pad_h)).reshape(1, HIDDEN)
        self.w3_p = jnp.pad(self.w3, ((0, pad_h), (0, 0))).astype(weight_dtype)
        self.b3_p = self.b3.reshape(1, self.out_dim)

        # Layer-1 weight, split by input: both halves stay f32 because the
        # whole first layer is computed outside the kernel at high precision.
        self.w1_task = w1_p[:task_emb_dims, :]                # (task_emb_dims, 128)
        self.w1_block = w1_p[task_emb_dims:, :]               # (block_emb_dims, 128)


def _layer1_inputs(params: HyperPrefixParams, task_ids):
    """h1_base = block_emb @ w1_block, b1_eff[t] = task_emb[t] @ w1_task + b1.

    Both computed in f32 at HIGHEST precision so the layer-1 fold matches the
    fp32 PyTorch path."""
    h1_base = jnp.dot(params.block_emb, params.w1_block,
                      precision=jax.lax.Precision.HIGHEST)        # (B, 128)
    te = params.task_embs[task_ids]                               # (T, task_emb_dims)
    b1_eff = jnp.dot(te, params.w1_task,
                     precision=jax.lax.Precision.HIGHEST) + params.b1_p  # (T, 128)
    return h1_base, b1_eff


def hyperprefix_forward(params: HyperPrefixParams, task_id, *, tn=None):
    """Equivalent of HyperPrefix.forward(task_id) for use_block_emb=True,
    block_emb_sharing=True.  Returns the stacked
    (block_nums, 2, prefix_length, in_dims) array — the same data the torch
    module returns as a Python list of per-block tensors."""
    task_ids = jnp.atleast_1d(jnp.asarray(task_id, dtype=jnp.int32))
    h1_base, b1_eff = _layer1_inputs(params, task_ids)
    out = hyperprefix_mlp(h1_base, b1_eff, params.w2_p, params.b2_p,
                          params.w3_p, params.b3_p, tn=tn)   # (1, B, out_dim)
    return out[0].reshape(params.block_nums, 2, params.prefix_length,
                          params.in_dims)


def hyperprefix_forward_all_tasks(params: HyperPrefixParams, task_ids, *,
                                  tn=None):
    """Batched forward: one pallas_call for several task_ids (tasks are folded
    into the matmul row dimension, so w3 is still streamed only once).
    Returns (T, block_nums, 2, prefix_length, in_dims)."""
    task_ids = jnp.asarray(task_ids, dtype=jnp.int32)
    h1_base, b1_eff = _layer1_inputs(params, task_ids)
    out = hyperprefix_mlp(h1_base, b1_eff, params.w2_p, params.b2_p,
                          params.w3_p, params.b3_p, tn=tn)   # (T, B, out_dim)
    return out.reshape(task_ids.shape[0], params.block_nums, 2,
                       params.prefix_length, params.in_dims)


# --------------------------------- main --------------------------------------
if __name__ == "__main__":
    key = jax.random.PRNGKey(0)

    task_nums = 4
    block_nums = 8
    task_emb_dims = 16
    block_emb_dims = 16
    in_dims = 32
    prefix_length = 8
    task_id = 1

    params = HyperPrefixParams(key, task_nums, block_nums, task_emb_dims,
                               block_emb_dims, in_dims, prefix_length)

    # Single task (module-equivalent forward); out_dim=512 -> TN=256, grid=(2,).
    got = jax.block_until_ready(hyperprefix_forward(params, task_id))

    # All tasks folded into the matmul rows of one pallas_call.
    all_ids = jnp.arange(task_nums, dtype=jnp.int32)
    got_all = jax.block_until_ready(
        hyperprefix_forward_all_tasks(params, all_ids))

    # Pure-JAX reference: the original (unpadded, tile+concat) formulation.
    def reference(t):
        task_emb = jnp.tile(params.task_embs[t][None, :], (block_nums, 1))
        x = jnp.concatenate([task_emb, params.block_emb], axis=-1)
        h1 = jnp.maximum(x @ params.w1 + params.b1, 0.0)
        h2 = jnp.maximum(h1 @ params.w2 + params.b2, 0.0)
        y = h2 @ params.w3 + params.b3
        return y.reshape(block_nums, 2, prefix_length, in_dims)

    ref = reference(task_id)
    assert got.shape == (block_nums, 2, prefix_length, in_dims)
    assert jnp.allclose(got, ref, atol=1e-3, rtol=1e-3)

    ref_all = jnp.stack([reference(t) for t in range(task_nums)], axis=0)
    assert got_all.shape == (task_nums, block_nums, 2, prefix_length, in_dims)
    assert jnp.allclose(got_all, ref_all, atol=1e-3, rtol=1e-3)

    # bf16 storage for w2/w3 (halves the dominant w3 DMA bytes on v5e/v6e);
    # biases / accumulation stay f32, tolerance relaxed accordingly.
    params_bf16 = HyperPrefixParams(key, task_nums, block_nums, task_emb_dims,
                                    block_emb_dims, in_dims, prefix_length,
                                    weight_dtype=jnp.bfloat16)
    got_bf16 = jax.block_until_ready(
        hyperprefix_forward_all_tasks(params_bf16, all_ids))
    assert got_bf16.shape == ref_all.shape
    assert jnp.allclose(got_bf16, ref_all, atol=5e-2, rtol=5e-2)

    print("KERNEL_OK")
</pallas_src>

<mosaic_0001>
module attributes {stable_mosaic.version = 11 : i64} {
  func.func @hyperprefix_mlp_kernel(%arg0: i32, %arg1: memref<8x128xf32, #tpu.memory_space<vmem>>, %arg2: memref<1x128xf32, #tpu.memory_space<vmem>>, %arg3: memref<128x128xf32, #tpu.memory_space<vmem>>, %arg4: memref<1x128xf32, #tpu.memory_space<vmem>>, %arg5: memref<128x256xf32, #tpu.memory_space<vmem>>, %arg6: memref<1x256xf32, #tpu.memory_space<vmem>>, %arg7: memref<1x8x256xf32, #tpu.memory_space<vmem>>) attributes {dimension_semantics = [#tpu.dimension_semantics<parallel>], iteration_bounds = array<i64: 2>, scalar_prefetch = 0 : i64, scratch_operands = 0 : i64, tpu.core_type = #tpu.core_type<tc>, window_params = [{pipeline_mode = #tpu.pipeline_mode<synchronous>, transform_indices = @transform_0, window_bounds = array<i64: 8, 128>}, {pipeline_mode = #tpu.pipeline_mode<synchronous>, transform_indices = @transform_1, window_bounds = array<i64: 1, 128>}, {pipeline_mode = #tpu.pipeline_mode<synchronous>, transform_indices = @transform_2, window_bounds = array<i64: 128, 128>}, {pipeline_mode = #tpu.pipeline_mode<synchronous>, transform_indices = @transform_3, window_bounds = array<i64: 1, 128>}, {transform_indices = @transform_4, window_bounds = array<i64: 128, 256>}, {transform_indices = @transform_5, window_bounds = array<i64: 1, 256>}, {transform_indices = @transform_6, window_bounds = array<i64: 1, 8, 256>}]} {
    %c0 = arith.constant 0 : index
    %c0_0 = arith.constant 0 : index
    %0 = vector.load %arg1[%c0, %c0_0] : memref<8x128xf32, #tpu.memory_space<vmem>>, vector<8x128xf32>
    %1 = vector.shape_cast %0 : vector<8x128xf32> to vector<1x8x128xf32>
    %c0_1 = arith.constant 0 : index
    %c0_2 = arith.constant 0 : index
    %2 = vector.load %arg2[%c0_1, %c0_2] : memref<1x128xf32, #tpu.memory_space<vmem>>, vector<1x128xf32>
    %3 = vector.shape_cast %2 : vector<1x128xf32> to vector<1x1x128xf32>
    %4 = vector.broadcast %3 : vector<1x1x128xf32> to vector<1x8x128xf32>
    %5 = arith.addf %1, %4 : vector<1x8x128xf32>
    %cst = arith.constant 0.000000e+00 : f32
    %6 = vector.broadcast %cst : f32 to vector<1x8x128xf32>
    %7 = arith.maximumf %5, %6 : vector<1x8x128xf32>
    %8 = vector.shape_cast %7 : vector<1x8x128xf32> to vector<8x128xf32>
    %c0_3 = arith.constant 0 : index
    %c0_4 = arith.constant 0 : index
    %9 = vector.load %arg3[%c0_3, %c0_4] : memref<128x128xf32, #tpu.memory_space<vmem>>, vector<128x128xf32>
    %cst_5 = arith.constant dense<0.000000e+00> : vector<8x128xf32>
    %10 = tpu.matmul %8, %9, %cst_5 {dimension_numbers = #tpu.dot_dimension_numbers<[1], [0], [0], [1], [0, 0, 1, 1], [], []>} : vector<8x128xf32>, vector<128x128xf32>, vector<8x128xf32> -> vector<8x128xf32>
    %c0_6 = arith.constant 0 : index
    %c0_7 = arith.constant 0 : index
    %11 = vector.load %arg4[%c0_6, %c0_7] : memref<1x128xf32, #tpu.memory_space<vmem>>, vector<1x128xf32>
    %12 = vector.broadcast %11 : vector<1x128xf32> to vector<8x128xf32>
    %13 = arith.addf %10, %12 : vector<8x128xf32>
    %cst_8 = arith.constant 0.000000e+00 : f32
    %14 = vector.broadcast %cst_8 : f32 to vector<8x128xf32>
    %15 = arith.maximumf %13, %14 : vector<8x128xf32>
    %c0_9 = arith.constant 0 : index
    %c0_10 = arith.constant 0 : index
    %16 = vector.load %arg5[%c0_9, %c0_10] : memref<128x256xf32, #tpu.memory_space<vmem>>, vector<128x256xf32>
    %cst_11 = arith.constant dense<0.000000e+00> : vector<8x256xf32>
    %17 = tpu.matmul %15, %16, %cst_11 {dimension_numbers = #tpu.dot_dimension_numbers<[1], [0], [0], [1], [0, 0, 1, 1], [], []>} : vector<8x128xf32>, vector<128x256xf32>, vector<8x256xf32> -> vector<8x256xf32>
    %c0_12 = arith.constant 0 : index
    %c0_13 = arith.constant 0 : index
    %18 = vector.load %arg6[%c0_12, %c0_13] : memref<1x256xf32, #tpu.memory_space<vmem>>, vector<1x256xf32>
    %19 = vector.broadcast %18 : vector<1x256xf32> to vector<8x256xf32>
    %20 = arith.addf %17, %19 : vector<8x256xf32>
    %21 = vector.shape_cast %20 : vector<8x256xf32> to vector<1x8x256xf32>
    %c0_14 = arith.constant 0 : index
    %c0_15 = arith.constant 0 : index
    %c0_16 = arith.constant 0 : index
    %22 = vector.load %arg7[%c0_14, %c0_15, %c0_16] : memref<1x8x256xf32, #tpu.memory_space<vmem>>, vector<1x8x256xf32>
    tpu.vector_store %arg7[%c0_14, %c0_15, %c0_16], %21 {strides = array<i32>} : memref<1x8x256xf32, #tpu.memory_space<vmem>>, vector<1x8x256xf32>,
    return
  }
  func.func @transform_0(%arg0: i32) -> (i32, i32) {
    %c0_i32 = arith.constant 0 : i32
    %c0_i32_0 = arith.constant 0 : i32
    %c0_i32_1 = arith.constant 0 : i32
    return %c0_i32, %c0_i32_0 : i32, i32
  }
  func.func @transform_1(%arg0: i32) -> (i32, i32) {
    %c0_i32 = arith.constant 0 : i32
    %c0_i32_0 = arith.constant 0 : i32
    %c0_i32_1 = arith.constant 0 : i32
    return %c0_i32, %c0_i32_0 : i32, i32
  }
  func.func @transform_2(%arg0: i32) -> (i32, i32) {
    %c0_i32 = arith.constant 0 : i32
    %c0_i32_0 = arith.constant 0 : i32
    %c0_i32_1 = arith.constant 0 : i32
    return %c0_i32, %c0_i32_0 : i32, i32
  }
  func.func @transform_3(%arg0: i32) -> (i32, i32) {
    %c0_i32 = arith.constant 0 : i32
    %c0_i32_0 = arith.constant 0 : i32
    %c0_i32_1 = arith.constant 0 : i32
    return %c0_i32, %c0_i32_0 : i32, i32
  }
  func.func @transform_4(%arg0: i32) -> (i32, i32) {
    %c0_i32 = arith.constant 0 : i32
    %c0_i32_0 = arith.constant 0 : i32
    return %c0_i32, %arg0 : i32, i32
  }
  func.func @transform_5(%arg0: i32) -> (i32, i32) {
    %c0_i32 = arith.constant 0 : i32
    %c0_i32_0 = arith.constant 0 : i32
    return %c0_i32, %arg0 : i32, i32
  }
  func.func @transform_6(%arg0: i32) -> (i32, i32, i32) {
    %c0_i32 = arith.constant 0 : i32
    %c0_i32_0 = arith.constant 0 : i32
    %c0_i32_1 = arith.constant 0 : i32
    return %c0_i32, %c0_i32_0, %arg0 : i32, i32, i32
  }
}

</mosaic_0001>

<bundles_post_ra>
// kernel: tpu_custom_call.1
= control target key start
LH: loop header
LB: loop body
LE: loop exit
PB: predicated region body
PF: predicated region fallthrough
CT: control target
= control target key end

     0   :  { %s1217_s0 = inlined_call_operand.hbm [shape: f32[8,128], index: 0, kind: input, shape index: {}]   ;;  %s1218_s1 = inlined_call_operand.hbm [shape: f32[1,128], index: 1, kind: input, shape index: {}]   ;;  %s1219_s2 = inlined_call_operand.hbm [shape: f32[128,128], index: 2, kind: input, shape index: {}]   ;;  %s1220_s3 = inlined_call_operand.hbm [shape: f32[1,128], index: 3, kind: input, shape index: {}]   ;;  %s1221_s4 = inlined_call_operand.hbm [shape: f32[128,512], index: 4, kind: input, shape index: {}]   ;;  %s1222_s5 = inlined_call_operand.vmem [shape: f32[1,512], index: 5, kind: input, shape index: {}]   ;;  %s1223_s6 = inlined_call_operand.hbm [shape: f32[1,8,512], index: 6, kind: output, shape index: {}]  }
   0x1   :  { %1226 = sst [smem:[#allocation19_spill]] %s1217_s0 }
   0x2   :  { %1227 = sst [smem:[#allocation20_spill]] %s1218_s1 }
   0x3   :  { %1228 = sst [smem:[#allocation21_spill]] %s1219_s2 }
   0x4   :  { %11 = vsyncpa [#allocation3], 0 }
   0x5   :  { %12 = vsyncpa [#allocation6], 0 }
   0x6   :  { %13 = vsyncpa [#allocation9], 0 }
   0x7   :  { %14 = vsyncpa [#allocation4], 0 }
   0x8   :  { %16 = vsyncpa [#allocation4 + $0x1], 0  ;;  %s1006_s21 = smov 0   ;;  %s1008_s22 = smov 0  }
   0x9   :  { %s1010_s23 = smov 0   ;;  %s1012_s24 = smov 0  }
   0xa LB: > { %s1027_s25 = sadd.s32 4294967295, %s960_s24   ;;  %s613_s26 = sadd.s32 4294967294, %s960_s24   ;;  %s960_s24 = sphi %s1012_s24, %s1242_s24   ;;  %s956_s23 = sphi %s1010_s23, %s1246_s23   ;;  %s952_s22 = sphi %s1008_s22, %s1245_s22   ;;  %s948_s21 = sphi %s1006_s21, %s1244_s21  }
   0xb   : > { %s1031_s27 = sadd.s32 1, %s960_s24   ;;  %s113_s28 = sadd.s32 1, %s956_s23 }
   0xc   : > { %1229 = sst [smem:[#allocation17_spill]] %s1031_s27  ;;  %s110_s29 = ssub.s32 %s960_s24, %s1031_s27 }
   0xd   : > { %p120_p0 = scmp.ne.s32.totalorder %s956_s23, %s952_s22  ;;  %p111_p1 = scmp.eq.s32.totalorder %s110_s29, 0 }
   0xe   : > { %p121_p2 = scmp.eq.s32.totalorder %s960_s24, 0  ;;  %p126_p3 = scmp.ne.s32.totalorder %s952_s22, %s948_s21 }
   0xf   : > { %p127_p4 = scmp.eq.s32.totalorder %s1027_s25, 0  ;;  %p176_p7 = scmp.eq.s32.totalorder %s1027_s25, 1 }
  0x10   : > { %s1043_s30 = scalar_select %p111_p1, %s956_s23, %s113_s28  }
  0x11   : > { %p1045_p5 = por %p121_p2, %p120_p0  ;;  %p1051_p6 = por %p127_p4, %p126_p3 }
  0x12   : > { %1230 = sst [smem:[#allocation18_spill]] %s1043_s30  ;;  %p182_p8 = scmp.eq.s32.totalorder %s613_s26, 1 }
  0x13   : > { %p614_p9 = scmp.ge.s32.totalorder %s960_s24, 1  ;;  %p189_p10 = scmp.lt.s32.totalorder %s960_s24, 3 }
  0x14   : > { %p1058_p11 = por %p176_p7, %p120_p0  ;;  %p1062_p12 = por %p182_p8, %p126_p3 }
  0x15   : > { %p1066_p13 = pnand %p614_p9, %p189_p10  ;;  %s1236_s0 = sld [smem:[#allocation19_spill]] }
  0x16   : > { %s962_s15 = smov [#allocation2]   ;;  %p683_p3 = scmp.lt.s32.totalorder %s960_s24, 2 }
  0x17   : > { %p658_p1 = pneg %p1066_p13  ;;  %s203_s16 = sshll.u32 %s962_s15, 4  ;;  %s204_s16 = int_to_ptr.vmem [resolvable:$true] %s203_s16 }
  0x18   : > { %s1238_s1 = sld [smem:[#allocation20_spill]]  ;;  %p1090_p7 = pnand %p683_p3, %p1045_p5 }
  0x19   : > { %p1078_p2 = pnand %p658_p1, %p127_p4  ;;  %s963_s28 = smov [#allocation5]  }
  0x1a   : > { %s215_s29 = sshll.u32 %s963_s28, 4  ;;  %s1240_s2 = sld [smem:[#allocation21_spill]]  ;;  %s216_s29 = int_to_ptr.vmem [resolvable:$true] %s215_s29 }
  0x1b   : > { %s201_s14 = sshll.u32 %s1236_s0, 4  ;;  %s966_s18 = smov 8   ;;  %s202_s14 = int_to_ptr.hbm [resolvable:$true] %s201_s14 }
  0x1c   : > { %661 = dma.hbm_to_vmem [thread:$0]  (!%p1078_p2), %s202_s14, 128, %s204_s16, [#allocation3]  }
  0x1d   : > { %s964_s14 = smov [#allocation7]   ;;  %s965_s16 = smov 128  }
  0x1e   : > { %s213_s20 = sshll.u32 %s1238_s1, 4  ;;  %s226_s7 = sshll.u32 %s964_s14, 4  ;;  %s214_s20 = int_to_ptr.hbm [resolvable:$true] %s213_s20  ;;  %s227_s7 = int_to_ptr.vmem [resolvable:$true] %s226_s7 }
  0x1f   : > { %664 = dma.hbm_to_vmem [thread:$0]  (!%p1078_p2), %s214_s20, 16, %s216_s29, [#allocation6]  }
  0x20   : > { %s224_s15 = sshll.u32 %s1240_s2, 4  ;;  %s239_s12 = sshll.u32 %s1220_s3, 4  ;;  %s225_s15 = int_to_ptr.hbm [resolvable:$true] %s224_s15  ;;  %s240_s12 = int_to_ptr.hbm [resolvable:$true] %s239_s12 }
  0x21   : > { %667 = dma.hbm_to_vmem [thread:$0]  (!%p1078_p2), %s225_s15, 2048, %s227_s7, [#allocation6], %s965_s16, %s965_s16, %s966_s18  }
  0x22   : > { %s967_s13 = smov [#allocation8]   ;;  %s252_s1 = sand.u32 1, %s960_s24  }
  0x23   : > { %s241_s0 = sshll.u32 %s967_s13, 4  ;;  %s254_s20 = sand.u32 1, %s956_s23   ;;  %s242_s0 = int_to_ptr.vmem [resolvable:$true] %s241_s0 }
  0x24   : > { %670 = dma.hbm_to_vmem [thread:$0]  (!%p1078_p2), %s240_s12, 16, %s242_s0, [#allocation9]  }
  0x25   : > { %s620_s29 = sshll.u32 %s254_s20, 8  ;;  %s636_s14 = sshll.u32 %s960_s24, 4 }
  0x26   : > { %s261_s27 = scalar_lea.hbm %s1221_s4, %s636_s14  ;;  %s256_s7 = scalar_lea.vmem [#allocation10], %s620_s29 }
  0x27   : > { %s262_s15 = sshll.u32 %s261_s27, 4  ;;  %s264_s16 = sshll.u32 %s256_s7, 4  ;;  %s263_s15 = int_to_ptr.hbm [resolvable:$true] %s262_s15  ;;  %s265_s16 = int_to_ptr.vmem [resolvable:$true] %s264_s16 }
  0x28   : > { %s253_s18 = scalar_lea.sflag [#allocation3], %s252_s1  ;;  %s852_s19 = sshra.s32 %s263_s15, 4  ;;  %s853_s19 = int_to_ptr.hbm [resolvable:$true] %s852_s19 }
  0x29   : > { %s854_s28 = scalar_lea.hbm %s853_s19, 256  ;;  %p856_p8 = pneg %p1090_p7 }
  0x2a   : > { %p855_p5 = scmp.ne.s32.totalorder %s853_s19, %s854_s28  ;;  %s859_s12 = scalar_lea.hbm %s1221_s4, 512 }
  0x2b   : > { %p860_p1 = scmp.lt.s32.totalorder %s853_s19, %s1221_s4  ;;  %p861_p2 = scmp.lt.s32.totalorder %s859_s12, %s854_s28 }
  0x2c   : > { %p857_p9 = pnand %p856_p8, %p855_p5 }
  0x2d   : > { %p862_p3 = por %p861_p2, %p860_p1 }
  0x2e   : > { %p858_p10 = pneg %p857_p9 }
  0x30   : > { %p863_p0 = pnand %p862_p3, %p858_p10 }
  0x32   : > { %866 = shalt.err (!%p863_p0)
}
  0x33   : > { %s968_s1 = smov 512   ;;  %s969_s27 = smov 256  }
  0x34   : > { %s970_s13 = smov 16   ;;  %284 = sbr.rel (%p1066_p13) target bundleno = 365 (0x16d), region = 44 }
  0x35   : > { %674 = dma.hbm_to_vmem [thread:$0]  (!%p1090_p7), %s263_s15, 4096, %s265_s16, %s253_s18, %s968_s1, %s969_s27, %s970_s13  }
  0x39   : > { %927 = dma.done.wait (%p127_p4), [#allocation3], 128  }
  0x3a   : > { %929 = vsyncadd (%p127_p4), [#allocation3], 4294967168 }
  0x3b   : > { %931 = dma.done.wait (%p127_p4), [#allocation6], 2064  }
  0x3c   : > { %933 = vsyncadd (%p127_p4), [#allocation6], 4294965232 }
  0x3d   : > { %935 = dma.done.wait (%p127_p4), [#allocation9], 16  }
  0x3e   : > { %937 = vsyncadd (%p127_p4), [#allocation9], 4294967280  ;;  %s306_s11 = sand.u32 1, %s1027_s25   ;;  %s1138_s26 = sand.u32 1, %s952_s22  }
  0x3f   : > { %s628_s20 = sshll.u32 %s1138_s26, 8  ;;  %s307_s29 = scalar_lea.sflag [#allocation3], %s306_s11 }
  0x40   : > { %s1141_s14 = scalar_lea.vmem [#allocation10], %s628_s20 }
  0x41   : > { %939 = dma.done.wait (%p1051_p6), %s307_s29, 4096  }
  0x42   : > { %941 = vsyncadd (%p1051_p6), %s307_s29, 4294963200  ;;  %v373_v0 = vld [vmem:[#allocation7 + $0x78] sm:$0xff]  ;;  %v372_v1 = vld [vmem:[#allocation7 + $0x70] sm:$0xff]  ;;  %s630_s8 = sshll.u32 %s1027_s25, 1  ;;  %s629_s18 = sshll.u32 %s1138_s26, 4 }
  0x43   : > { %378 = vmatpush.msra.mxu0 %v373_v0  ;;  %v371_v2 = vld [vmem:[#allocation7 + $0x68] sm:$0xff]  ;;  %v370_v3 = vld [vmem:[#allocation7 + $0x60] sm:$0xff]  ;;  %v369_v4 = vld [vmem:[#allocation7 + $0x58] sm:$0xff]  ;;  %p346_p4 = scmp.lt.s32.totalorder %s630_s8, 3  ;;  %s637_s19 = sshll.u32 %s1027_s25, 4 }
  0x44   : > { %v429_v5 = vld [vmem:[%s1141_s14 + $0xf0] sm:$0xff]  ;;  %v430_v6 = vld [vmem:[%s1141_s14 + $0xf8] sm:$0xff]  ;;  %v427_v7 = vld [vmem:[%s1141_s14 + $0xe0] sm:$0xff]  ;;  %s491_s17 = scalar_lea.hbm %s1223_s6, %s637_s19  ;;  %s343_s12 = scalar_lea.vmem [#allocation11], %s629_s18 }
  0x45   : > { %379 = vmatpush.msra.mxu0 %v372_v1  ;;  %437 = vmatpush.msra.mxu1 %v429_v5  ;;  %v428_v8 = vld [vmem:[%s1141_s14 + $0xe8] sm:$0xff]  ;;  %v425_v10 = vld [vmem:[%s1141_s14 + $0xd0] sm:$0xff]  ;;  %v426_v11 = vld [vmem:[%s1141_s14 + $0xd8] sm:$0xff]  ;;  %s1248_s8 = smov (!%p346_p4, %s630_s8), 3  ;;  %s493_s2 = sshll.u32 %s343_s12, 4  ;;  %s494_s2 = int_to_ptr.vmem [resolvable:$true] %s493_s2 }
  0x46   : > { %v368_v9 = vld [vmem:[#allocation7 + $0x50] sm:$0xff]  ;;  %457 = vmatpush.msra.mxu2 %v430_v6  ;;  %v367_v12 = vld [vmem:[#allocation7 + $0x48] sm:$0xff]  ;;  %v366_v15 = vld [vmem:[#allocation7 + $0x40] sm:$0xff]  ;;  %s348_s16 = scalar_lea.vmem %s1222_s5, %s1248_s8  ;;  %s495_s30 = sshll.u32 %s491_s17, 4  ;;  %s496_s30 = int_to_ptr.hbm [resolvable:$true] %s495_s30 }
  0x47   : > { %380 = vmatpush.msra.mxu0 %v371_v2  ;;  %438 = vmatpush.msra.mxu1 %v427_v7  ;;  %v423_v13 = vld [vmem:[%s1141_s14 + $0xc0] sm:$0xff]  ;;  %v424_v14 = vld [vmem:[%s1141_s14 + $0xc8] sm:$0xff]  ;;  %v421_v16 = vld [vmem:[%s1141_s14 + $0xb0] sm:$0xff]  ;;  %s480_s1 = scalar_lea.sflag [#allocation4], %s1138_s26  ;;  %s896_s27 = sshra.s32 %s496_s30, 4  ;;  %s897_s27 = int_to_ptr.hbm [resolvable:$true] %s896_s27 }
  0x48   : > { %458 = vmatpush.msra.mxu2 %v428_v8  ;;  %v422_v17 = vld [vmem:[%s1141_s14 + $0xb8] sm:$0xff]  ;;  %v419_v19 = vld [vmem:[%s1141_s14 + $0xa0] sm:$0xff]  ;;  %v420_v20 = vld [vmem:[%s1141_s14 + $0xa8] sm:$0xff]  ;;  %s898_s25 = scalar_lea.hbm %s897_s27, 16  ;;  %s902_s20 = scalar_lea.hbm %s1223_s6, 32 }
  0x49   : > { %381 = vmatpush.msra.mxu0 %v370_v3  ;;  %439 = vmatpush.msra.mxu1 %v425_v10  ;;  %v365_v18 = vld [vmem:[#allocation7 + $0x38] sm:$0xff]  ;;  %v364_v21 = vld [vmem:[#allocation7 + $0x30] sm:$0xff]  ;;  %v363_v24 = vld [vmem:[#allocation7 + $0x28] sm:$0xff]  ;;  %p899_p6 = scmp.ne.s32.totalorder %s897_s27, %s898_s25  ;;  %p903_p7 = scmp.lt.s32.totalorder %s897_s27, %s1223_s6 }
  0x4a   : > { %459 = vmatpush.msra.mxu2 %v426_v11  ;;  %v417_v22 = vld [vmem:[%s1141_s14 + $0x90] sm:$0xff]  ;;  %v418_v23 = vld [vmem:[%s1141_s14 + $0x98] sm:$0xff]  ;;  %v415_v25 = vld [vmem:[%s1141_s14 + $0x80] sm:$0xff]  ;;  %p904_p5 = scmp.lt.s32.totalorder %s902_s20, %s898_s25 }
  0x4b   : > { %382 = vmatpush.msra.mxu0 %v369_v4  ;;  %440 = vmatpush.msra.mxu1 %v423_v13  ;;  %v416_v26 = vld [vmem:[%s1141_s14 + $0x88] sm:$0xff]  ;;  %v362_v27 = vld [vmem:[#allocation7 + $0x20] sm:$0xff]  ;;  %v730_v28 = vld [vmem:[#allocation5] ss:$0 sm:$0xff]  ;;  %p900_p13 = pnand %p899_p6, %p1058_p11 }
  0x4c   : > { %460 = vmatpush.msra.mxu2 %v424_v14  ;;  %v413_v29 = vld [vmem:[%s1141_s14 + $0x70] sm:$0xff]  ;;  %v414_v31 = vld [vmem:[%s1141_s14 + $0x78] sm:$0xff]  ;;  %v411_v33 = vld [vmem:[%s1141_s14 + $0x60] sm:$0xff]  ;;  %p905_p8 = por %p904_p5, %p903_p7 }
  0x4d   : > { %383 = vmatpush.msra.mxu0 %v368_v9  ;;  %441 = vmatpush.msra.mxu1 %v421_v16  ;;  %v351_v30 = vld [vmem:[#allocation2] sm:$0xff]  ;;  %v412_v34 = vld [vmem:[%s1141_s14 + $0x68] sm:$0xff]  ;;  %v407_v40 = vld [vmem:[%s1141_s14 + $0x40] sm:$0xff]  ;;  %p901_p0 = pneg %p900_p13 }
  0x4e   : > { %461 = vmatpush.msra.mxu2 %v422_v17  ;;  %v361_v32 = vld [vmem:[#allocation7 + $0x18] sm:$0xff]  ;;  %v360_v35 = vld [vmem:[#allocation7 + $0x10] sm:$0xff]  ;;  %v356_v36 = vadd.f32 %v730_v28, %v351_v30  ;;  %v359_v39 = vld [vmem:[#allocation7 + $0x8] sm:$0xff] }
  0x4f   : > { %384 = vmatpush.msra.mxu0 %v367_v12  ;;  %442 = vmatpush.msra.mxu1 %v419_v19  ;;  %v409_v37 = vld [vmem:[%s1141_s14 + $0x50] sm:$0xff]  ;;  %v410_v38 = vld [vmem:[%s1141_s14 + $0x58] sm:$0xff]  ;;  %v408_v41 = vld [vmem:[%s1141_s14 + $0x48] sm:$0xff]  ;;  %p906_p9 = pnand %p905_p8, %p901_p0 }
  0x50   : > { %462 = vmatpush.msra.mxu2 %v420_v20  ;;  %v358_v42 = vld [vmem:[#allocation7] sm:$0xff]  ;;  %v357_v43 = vmax.f32 %v356_v36, 0.0  ;;  %v405_v44 = vld [vmem:[%s1141_s14 + $0x30] sm:$0xff]  ;;  %v404_v47 = vld [vmem:[%s1141_s14 + $0x28] sm:$0xff] }
  0x51   : > { %385 = vmatpush.msra.mxu0 %v366_v15  ;;  %443 = vmatpush.msra.mxu1 %v417_v22  ;;  %v406_v45 = vld [vmem:[%s1141_s14 + $0x38] sm:$0xff]  ;;  %v403_v46 = vld [vmem:[%s1141_s14 + $0x20] sm:$0xff]  ;;  %v401_v48 = vld [vmem:[%s1141_s14 + $0x10] sm:$0xff] }
  0x52   : > { %463 = vmatpush.msra.mxu2 %v418_v23  ;;  %v402_v49 = vld [vmem:[%s1141_s14 + $0x18] sm:$0xff]  ;;  %v399_v50 = vld [vmem:[%s1141_s14] sm:$0xff]  ;;  %v400_v51 = vld [vmem:[%s1141_s14 + $0x8] sm:$0xff] }
  0x53   : > { %386 = vmatpush.msra.mxu0 %v365_v18  ;;  %444 = vmatpush.msra.mxu1 %v415_v25  ;;  %v731_v52 = vld [vmem:[#allocation8] ss:$0 sm:$0xff]  ;;  %v431_v56 = vld [vmem:[%s348_s16] sm:$0x3] }
  0x54   : > { %464 = vmatpush.msra.mxu2 %v416_v26  ;;  %v433_v57 = vperm.slane %v431_v56, 0  ;;  %v434_v60 = vperm.slane %v431_v56, 1 }
  0x55   : > { %387 = vmatpush.msra.mxu0 %v364_v21  ;;  %445 = vmatpush.msra.mxu1 %v413_v29 }
  0x56   : > { %465 = vmatpush.msra.mxu2 %v414_v31 }
  0x57   : > { %388 = vmatpush.msra.mxu0 %v363_v24  ;;  %446 = vmatpush.msra.mxu1 %v411_v33 }
  0x58   : > { %466 = vmatpush.msra.mxu2 %v412_v34 }
  0x59   : > { %389 = vmatpush.msra.mxu0 %v362_v27  ;;  %447 = vmatpush.msra.mxu1 %v409_v37 }
  0x5a   : > { %467 = vmatpush.msra.mxu2 %v410_v38 }
  0x5b   : > { %390 = vmatpush.msra.mxu0 %v361_v32  ;;  %448 = vmatpush.msra.mxu1 %v407_v40 }
  0x5c   : > { %468 = vmatpush.msra.mxu2 %v408_v41 }
  0x5d   : > { %391 = vmatpush.msra.mxu0 %v360_v35  ;;  %449 = vmatpush.msra.mxu1 %v405_v44 }
  0x5e   : > { %469 = vmatpush.msra.mxu2 %v406_v45 }
  0x5f   : > { %392 = vmatpush.msra.mxu0 %v359_v39  ;;  %450 = vmatpush.msra.mxu1 %v403_v46 }
  0x60   : > { %470 = vmatpush.msra.mxu2 %v404_v47 }
  0x61   : > { %393 = vmatpush.msra.mxu0 %v358_v42  ;;  %451 = vmatpush.msra.mxu1 %v401_v48 }
  0x62   : > { %394 = vmatmul.f32.vlgmr.msra.gmra.mxu0 %v357_v43  ;;  %471 = vmatpush.msra.mxu2 %v402_v49 }
  0x63   : > { %452 = vmatpush.msra.mxu1 %v399_v50 }
  0x64   : > { %472 = vmatpush.msra.mxu2 %v400_v51 }
  0xdf   : > { %v395_v53 = vpop.f32.mrf.mxu0 }
  0xe0   : > { %v396_v54 = vadd.f32 %v731_v52, %v395_v53 }
  0xe2   : > { %v398_v55 = vmax.f32 %v396_v54, 0.0 }
  0xe4   : > { %453 = vmatmul.f32.vlgmr.msra.gmra.mxu1 %v398_v55  ;;  %473 = vmatmul.f32.vlgmr.msra.gmra.mxu2 %v398_v55 }
 0x161   : > { %v454_v58 = vpop.f32.mrf.mxu1 }
 0x162   : > { %v455_v59 = vadd.f32 %v454_v58, %v433_v57 }
 0x164   : > { %477 = vst [vmem:[%s343_s12] sm:$0xff] %v455_v59 }
 0x167   : > { %v474_v61 = vpop.f32.mrf.mxu2 }
 0x168   : > { %v475_v62 = vadd.f32 %v474_v61, %v434_v60 }
 0x16a   : > { %478 = vst [vmem:[%s343_s12 + $0x8] sm:$0xff] %v475_v62 }
 0x16b   : > { %909 = shalt.err (!%p906_p9)
}
 0x16c   : > { %656 = dma.vmem_to_hbm [thread:$0]  (%p1058_p11), %s494_s2, 256, %s496_s30, %s480_s1  }
 0x16d PF: > { %s507_s26 = sand.u32 1, %s948_s21   ;;  %p1241_p10 = scmp.ge.s32.totalorder %s960_s24, 2 }
 0x16e   : > { %s508_s8 = scalar_lea.sflag [#allocation4], %s507_s26 }
 0x16f   : > { %p676_p1 = pnand %p1241_p10, %p1062_p12 }
 0x171   : > { %p677_p2 = pneg %p676_p1 }
 0x173   : > { %943 = dma.done.wait (%p677_p2), %s508_s8, 256  }
 0x174   : > { %945 = vsyncadd (%p677_p2), %s508_s8, 4294967040  ;;  %s1242_s24 = sld [smem:[#allocation17_spill]]  ;;  %s1244_s21 = smov %s952_s22 }
 0x175   : > { %s1243_s15 = sld [smem:[#allocation18_spill]]  ;;  %s1245_s22 = smov %s956_s23 }
 0x17a   : > { %p19_p3 = scmp.ge.s32.totalorder %s1242_s24, 4  }
 0x17b   : > { %s1246_s23 = smov %s1243_s15 }
 0x17c   :  { %21 = sbr.rel (!%p19_p3) target bundleno = 10 (0xa), region = 107 }
 0x181   :  { %514 = vsyncpa [#allocation3], 1 }
 0x182   :  { %516 = vsyncpa [#allocation3 + $0x1], 1 }
 0x183   :  { %517 = vsyncpa [#allocation6], 1 }
 0x184   :  { %518 = vsyncpa [#allocation9], 1 }
 0x185   :  { %519 = vsyncpa [#allocation4], 1 }
 0x186   :  { %521 = vsyncpa [#allocation4 + $0x1], 1 }

</bundles_post_ra>
